<compile_context>
chip_gen: v7x
topology: tpu7x:2x2x1
jax: 0.10.0
libtpu: 0.0.40
codegen_flags: <defaults>
</compile_context>

<pallas_src>
import functools

import jax
import jax.numpy as jnp
from jax import lax
from jax.experimental import pallas as pl
from jax.experimental.pallas import tpu as pltpu

T1 = 0.05          # temperature buffer value from __init__
EPS = 1e-05        # eps added inside the log (module-level `eps`)
NORM_EPS = 1e-12   # F.normalize default eps


def _contrastive_kernel(q_ref, kT_ref, out_ref,
                        colsum_ref, diagexp_ref, rowloss_ref, invk_ref,
                        *, batch_size, row_tile, temperature):
    i = pl.program_id(0)
    inv_t = 1.0 / temperature

    @pl.when(i == 0)
    def _init():
        kf = kT_ref[...].astype(jnp.float32)                                  # (D, B)
        invk_ref[...] = 1.0 / jnp.maximum(
            jnp.sqrt(jnp.sum(kf * kf, axis=0, keepdims=True)), NORM_EPS)      # (1, B)
        colsum_ref[...] = jnp.zeros_like(colsum_ref)
        diagexp_ref[...] = jnp.zeros_like(diagexp_ref)
        rowloss_ref[...] = jnp.zeros_like(rowloss_ref)

    q = q_ref[...]                                                            # (tm, D) input dtype
    qf = q.astype(jnp.float32)
    inv_q = 1.0 / jnp.maximum(
        jnp.sqrt(jnp.sum(qf * qf, axis=1, keepdims=True)), NORM_EPS)          # (tm, 1)

    # Single MXU matmul in the input dtype with f32 accumulation; cosine
    # similarities come from scaling by the outer product of inverse norms
    # afterwards (equivalent to normalize-then-dot).
    s = lax.dot_general(q, kT_ref[...], (((1,), (0,)), ((), ())),
                        preferred_element_type=jnp.float32)                   # (tm, B)
    # Exponent magnitude <= 1/temperature = 20 for cosine sims in [-1, 1], so no
    # max-subtraction is needed at the default temperature.
    e = jnp.exp(s * ((inv_q * inv_t) * invk_ref[...]))                        # (tm, B) f32

    # Diagonal of the full (B, B) similarity matrix: local row r of this tile
    # corresponds to global column i*row_tile + r.
    row_idx = lax.broadcasted_iota(jnp.int32, e.shape, 0)
    col_idx = lax.broadcasted_iota(jnp.int32, e.shape, 1)
    e_diag = jnp.where(col_idx == row_idx + i * row_tile, e, 0.0)             # exp(diag/t)

    # qk direction (rows): denominator is the plain full row sum because the
    # masked-out diagonal term equals the nominator.
    nom_rows = jnp.sum(e_diag, axis=1, keepdims=True)                         # (tm, 1)
    den_rows = jnp.sum(e, axis=1, keepdims=True)                              # (tm, 1)
    row_losses = -jnp.log(nom_rows / den_rows + EPS)                          # (tm, 1)
    rowloss_ref[...] += jnp.sum(row_losses, axis=0, keepdims=True)            # (1, 1)

    # kq direction (columns of the same exp matrix): accumulate column sums and
    # diagonal exponentials across row tiles.
    colsum_ref[...] += jnp.sum(e, axis=0, keepdims=True)                      # (1, B)
    diagexp_ref[...] += jnp.sum(e_diag, axis=0, keepdims=True)                # (1, B)

    @pl.when(i == pl.num_programs(0) - 1)
    def _finish():
        col_losses = -jnp.log(diagexp_ref[...] / colsum_ref[...] + EPS)       # (1, B)
        total = rowloss_ref[...] + jnp.sum(col_losses, axis=1, keepdims=True)
        out_ref[...] = total * (1.0 / batch_size)                             # (1, 1)


def _row_tile(batch):
    # Largest power-of-two row tile (multiple of 8 sublanes) dividing the batch;
    # fall back to the whole batch (block == full array is always legal).
    for tm in (512, 256, 128, 64, 32, 16, 8):
        if batch % tm == 0:
            return tm
    return batch


def unsupervised_contrastive_loss(q, k, temperature=T1):
    """q, k: (B, D) arrays. Returns the scalar NT-Xent loss (float32)."""
    assert q.shape == k.shape and q.ndim == 2
    B, D = q.shape
    tm = _row_tile(B)
    grid = (B // tm,) if B % tm == 0 else (1,)
    kT = k.T  # (D, B): RHS contraction lands on sublanes, no in-kernel transpose.

    kernel = functools.partial(
        _contrastive_kernel, batch_size=B, row_tile=tm,
        temperature=float(temperature))

    out = pl.pallas_call(
        kernel,
        out_shape=jax.ShapeDtypeStruct((1, 1), jnp.float32),
        grid_spec=pltpu.PrefetchScalarGridSpec(
            num_scalar_prefetch=0,
            grid=grid,
            in_specs=[
                pl.BlockSpec((tm, D), lambda i: (i, 0)),   # q row tile
                pl.BlockSpec((D, B), lambda i: (0, 0)),    # k^T resident
            ],
            out_specs=pl.BlockSpec((1, 1), lambda i: (0, 0)),
            scratch_shapes=[
                pltpu.VMEM((1, B), jnp.float32),   # column sums of exp
                pltpu.VMEM((1, B), jnp.float32),   # diagonal exponentials
                pltpu.VMEM((1, 1), jnp.float32),   # row-direction loss partial
                pltpu.VMEM((1, B), jnp.float32),   # cached 1/||k_j||
            ]),
        compiler_params=pltpu.CompilerParams(
            dimension_semantics=("arbitrary",),
            vmem_limit_bytes=32 * 1024 * 1024),
    )(q, kT)
    return out[0, 0]


def _reference(q, k, temperature=T1):
    # Pure-JAX replica of the PyTorch forward for verification.
    B = q.shape[0]
    qn = q / jnp.maximum(jnp.linalg.norm(q, axis=1, keepdims=True), NORM_EPS)
    kn = k / jnp.maximum(jnp.linalg.norm(k, axis=1, keepdims=True), NORM_EPS)
    rep = jnp.concatenate([qn, kn], axis=0)
    sim = rep @ rep.T
    sim_qk = jnp.diagonal(sim, B)
    sim_kq = jnp.diagonal(sim, -B)
    mask = 1.0 - jnp.eye(B)
    nom_qk = jnp.exp(sim_qk / temperature)
    den_qk = nom_qk + jnp.sum(mask * jnp.exp(sim[:B, B:] / temperature), axis=1)
    nom_kq = jnp.exp(sim_kq / temperature)
    den_kq = nom_kq + jnp.sum(mask * jnp.exp(sim[B:, :B] / temperature), axis=1)
    loss_qk = jnp.sum(-jnp.log(nom_qk / den_qk + EPS)) / B
    loss_kq = jnp.sum(-jnp.log(nom_kq / den_kq + EPS)) / B
    return loss_qk + loss_kq


if __name__ == "__main__":
    key = jax.random.PRNGKey(0)
    kq, kk = jax.random.split(key)
    B, D = 8, 32  # batch_size=8, feature dim=32
    q = jax.random.normal(kq, (B, D), dtype=jnp.float32)
    k = jax.random.normal(kk, (B, D), dtype=jnp.float32)

    loss = jax.block_until_ready(unsupervised_contrastive_loss(q, k))
    ref = _reference(q, k)
    assert jnp.allclose(loss, ref, rtol=1e-4, atol=1e-4), (float(loss), float(ref))
    print("KERNEL_OK")
</pallas_src>

<mosaic_0001>
module attributes {stable_mosaic.version = 11 : i64} {
  func.func @_contrastive_kernel(%arg0: i32, %arg1: memref<8x32xf32, #tpu.memory_space<vmem>>, %arg2: memref<32x8xf32, #tpu.memory_space<vmem>>, %arg3: memref<1x1xf32, #tpu.memory_space<vmem>>, %arg4: memref<1x8xf32, #tpu.memory_space<vmem>>, %arg5: memref<1x8xf32, #tpu.memory_space<vmem>>, %arg6: memref<1x1xf32, #tpu.memory_space<vmem>>, %arg7: memref<1x8xf32, #tpu.memory_space<vmem>>) attributes {dimension_semantics = [#tpu.dimension_semantics<arbitrary>], iteration_bounds = array<i64: 1>, scalar_prefetch = 0 : i64, scratch_operands = 4 : i64, tpu.core_type = #tpu.core_type<tc>, window_params = [{transform_indices = @transform_0, window_bounds = array<i64: 8, 32>}, {pipeline_mode = #tpu.pipeline_mode<synchronous>, transform_indices = @transform_1, window_bounds = array<i64: 32, 8>}, {pipeline_mode = #tpu.pipeline_mode<synchronous>, transform_indices = @transform_2, window_bounds = array<i64: 1, 1>}]} {
    %c0_i32 = arith.constant 0 : i32
    %0 = arith.cmpi eq, %arg0, %c0_i32 : i32
    %1 = arith.extui %0 : i1 to i32
    %c0_i32_0 = arith.constant 0 : i32
    %2 = arith.cmpi ne, %1, %c0_i32_0 : i32
    scf.if %2 {
      %c0_32 = arith.constant 0 : index
      %c0_33 = arith.constant 0 : index
      %58 = vector.load %arg2[%c0_32, %c0_33] : memref<32x8xf32, #tpu.memory_space<vmem>>, vector<32x8xf32>
      %59 = arith.mulf %58, %58 : vector<32x8xf32>
      %cst_34 = arith.constant dense<0.000000e+00> : vector<8xf32>
      %60 = vector.multi_reduction <add>, %59, %cst_34 [0] : vector<32x8xf32> to vector<8xf32>
      %61 = vector.shape_cast %60 : vector<8xf32> to vector<1x8xf32>
      %62 = math.sqrt %61 : vector<1x8xf32>
      %cst_35 = arith.constant 9.99999996E-13 : f32
      %63 = vector.broadcast %cst_35 : f32 to vector<1x8xf32>
      %64 = arith.maximumf %62, %63 : vector<1x8xf32>
      %cst_36 = arith.constant 1.000000e+00 : f32
      %65 = vector.broadcast %cst_36 : f32 to vector<1x8xf32>
      %66 = arith.divf %65, %64 : vector<1x8xf32>
      %c0_37 = arith.constant 0 : index
      %c0_38 = arith.constant 0 : index
      %67 = vector.load %arg7[%c0_37, %c0_38] : memref<1x8xf32, #tpu.memory_space<vmem>>, vector<1x8xf32>
      tpu.vector_store %arg7[%c0_37, %c0_38], %66 {strides = array<i32>} : memref<1x8xf32, #tpu.memory_space<vmem>>, vector<1x8xf32>,
      %cst_39 = arith.constant 0.000000e+00 : f32
      %68 = vector.broadcast %cst_39 : f32 to vector<1x8xf32>
      %c0_40 = arith.constant 0 : index
      %c0_41 = arith.constant 0 : index
      %69 = vector.load %arg4[%c0_40, %c0_41] : memref<1x8xf32, #tpu.memory_space<vmem>>, vector<1x8xf32>
      tpu.vector_store %arg4[%c0_40, %c0_41], %68 {strides = array<i32>} : memref<1x8xf32, #tpu.memory_space<vmem>>, vector<1x8xf32>,
      %cst_42 = arith.constant 0.000000e+00 : f32
      %70 = vector.broadcast %cst_42 : f32 to vector<1x8xf32>
      %c0_43 = arith.constant 0 : index
      %c0_44 = arith.constant 0 : index
      %71 = vector.load %arg5[%c0_43, %c0_44] : memref<1x8xf32, #tpu.memory_space<vmem>>, vector<1x8xf32>
      tpu.vector_store %arg5[%c0_43, %c0_44], %70 {strides = array<i32>} : memref<1x8xf32, #tpu.memory_space<vmem>>, vector<1x8xf32>,
      %cst_45 = arith.constant 0.000000e+00 : f32
      %72 = vector.broadcast %cst_45 : f32 to vector<1x1xf32>
      %c0_46 = arith.constant 0 : index
      %c0_47 = arith.constant 0 : index
      %73 = vector.load %arg6[%c0_46, %c0_47] : memref<1x1xf32, #tpu.memory_space<vmem>>, vector<1x1xf32>
      tpu.vector_store %arg6[%c0_46, %c0_47], %72 {strides = array<i32>} : memref<1x1xf32, #tpu.memory_space<vmem>>, vector<1x1xf32>,
    } else {
    }
    %c0 = arith.constant 0 : index
    %c0_1 = arith.constant 0 : index
    %3 = vector.load %arg1[%c0, %c0_1] : memref<8x32xf32, #tpu.memory_space<vmem>>, vector<8x32xf32>
    %4 = arith.mulf %3, %3 : vector<8x32xf32>
    %cst = arith.constant dense<0.000000e+00> : vector<8xf32>
    %5 = vector.multi_reduction <add>, %4, %cst [1] : vector<8x32xf32> to vector<8xf32>
    %6 = vector.shape_cast %5 : vector<8xf32> to vector<8x1xf32>
    %7 = math.sqrt %6 : vector<8x1xf32>
    %cst_2 = arith.constant 9.99999996E-13 : f32
    %8 = vector.broadcast %cst_2 : f32 to vector<8x1xf32>
    %9 = arith.maximumf %7, %8 : vector<8x1xf32>
    %cst_3 = arith.constant 1.000000e+00 : f32
    %10 = vector.broadcast %cst_3 : f32 to vector<8x1xf32>
    %11 = arith.divf %10, %9 : vector<8x1xf32>
    %c0_4 = arith.constant 0 : index
    %c0_5 = arith.constant 0 : index
    %12 = vector.load %arg2[%c0_4, %c0_5] : memref<32x8xf32, #tpu.memory_space<vmem>>, vector<32x8xf32>
    %cst_6 = arith.constant dense<0.000000e+00> : vector<8x8xf32>
    %13 = tpu.matmul %3, %12, %cst_6 {dimension_numbers = #tpu.dot_dimension_numbers<[1], [0], [0], [1], [0, 0, 1, 1], [], []>} : vector<8x32xf32>, vector<32x8xf32>, vector<8x8xf32> -> vector<8x8xf32>
    %cst_7 = arith.constant 2.000000e+01 : f32
    %14 = vector.broadcast %cst_7 : f32 to vector<8x1xf32>
    %15 = arith.mulf %11, %14 : vector<8x1xf32>
    %c0_8 = arith.constant 0 : index
    %c0_9 = arith.constant 0 : index
    %16 = vector.load %arg7[%c0_8, %c0_9] : memref<1x8xf32, #tpu.memory_space<vmem>>, vector<1x8xf32>
    %17 = vector.broadcast %15 : vector<8x1xf32> to vector<8x8xf32>
    %18 = vector.broadcast %16 : vector<1x8xf32> to vector<8x8xf32>
    %19 = arith.mulf %17, %18 : vector<8x8xf32>
    %20 = arith.mulf %13, %19 : vector<8x8xf32>
    %21 = math.exp %20 : vector<8x8xf32>
    %22 = tpu.iota {dimensions = array<i32: 0>} : vector<8x8xi32>
    %23 = tpu.iota {dimensions = array<i32: 1>} : vector<8x8xi32>
    %c8_i32 = arith.constant 8 : i32
    %24 = arith.muli %arg0, %c8_i32 : i32
    %25 = vector.broadcast %24 : i32 to vector<8x8xi32>
    %26 = arith.addi %22, %25 : vector<8x8xi32>
    %27 = arith.cmpi eq, %23, %26 : vector<8x8xi32>
    %cst_10 = arith.constant 0.000000e+00 : f32
    %28 = vector.broadcast %cst_10 : f32 to vector<8x8xf32>
    %29 = arith.select %27, %21, %28 : vector<8x8xi1>, vector<8x8xf32>
    %cst_11 = arith.constant dense<0.000000e+00> : vector<8xf32>
    %30 = vector.multi_reduction <add>, %29, %cst_11 [1] : vector<8x8xf32> to vector<8xf32>
    %31 = vector.shape_cast %30 : vector<8xf32> to vector<8x1xf32>
    %cst_12 = arith.constant dense<0.000000e+00> : vector<8xf32>
    %32 = vector.multi_reduction <add>, %21, %cst_12 [1] : vector<8x8xf32> to vector<8xf32>
    %33 = vector.shape_cast %32 : vector<8xf32> to vector<8x1xf32>
    %34 = arith.divf %31, %33 : vector<8x1xf32>
    %cst_13 = arith.constant 9.99999974E-6 : f32
    %35 = vector.broadcast %cst_13 : f32 to vector<8x1xf32>
    %36 = arith.addf %34, %35 : vector<8x1xf32>
    %37 = math.log %36 : vector<8x1xf32>
    %cst_14 = arith.constant 0.000000e+00 : f32
    %38 = vector.broadcast %cst_14 : f32 to vector<8x1xf32>
    %39 = arith.subf %38, %37 : vector<8x1xf32>
    %c0_15 = arith.constant 0 : index
    %c0_16 = arith.constant 0 : index
    %40 = vector.load %arg6[%c0_15, %c0_16] : memref<1x1xf32, #tpu.memory_space<vmem>>, vector<1x1xf32>
    %cst_17 = arith.constant dense<0.000000e+00> : vector<1xf32>
    %41 = vector.multi_reduction <add>, %39, %cst_17 [0] : vector<8x1xf32> to vector<1xf32>
    %42 = vector.shape_cast %41 : vector<1xf32> to vector<1x1xf32>
    %43 = arith.addf %40, %42 : vector<1x1xf32>
    %c0_18 = arith.constant 0 : index
    %c0_19 = arith.constant 0 : index
    %44 = vector.load %arg6[%c0_18, %c0_19] : memref<1x1xf32, #tpu.memory_space<vmem>>, vector<1x1xf32>
    tpu.vector_store %arg6[%c0_18, %c0_19], %43 {strides = array<i32>} : memref<1x1xf32, #tpu.memory_space<vmem>>, vector<1x1xf32>,
    %c0_20 = arith.constant 0 : index
    %c0_21 = arith.constant 0 : index
    %45 = vector.load %arg4[%c0_20, %c0_21] : memref<1x8xf32, #tpu.memory_space<vmem>>, vector<1x8xf32>
    %cst_22 = arith.constant dense<0.000000e+00> : vector<8xf32>
    %46 = vector.multi_reduction <add>, %21, %cst_22 [0] : vector<8x8xf32> to vector<8xf32>
    %47 = vector.shape_cast %46 : vector<8xf32> to vector<1x8xf32>
    %48 = arith.addf %45, %47 : vector<1x8xf32>
    %c0_23 = arith.constant 0 : index
    %c0_24 = arith.constant 0 : index
    %49 = vector.load %arg4[%c0_23, %c0_24] : memref<1x8xf32, #tpu.memory_space<vmem>>, vector<1x8xf32>
    tpu.vector_store %arg4[%c0_23, %c0_24], %48 {strides = array<i32>} : memref<1x8xf32, #tpu.memory_space<vmem>>, vector<1x8xf32>,
    %c0_25 = arith.constant 0 : index
    %c0_26 = arith.constant 0 : index
    %50 = vector.load %arg5[%c0_25, %c0_26] : memref<1x8xf32, #tpu.memory_space<vmem>>, vector<1x8xf32>
    %cst_27 = arith.constant dense<0.000000e+00> : vector<8xf32>
    %51 = vector.multi_reduction <add>, %29, %cst_27 [0] : vector<8x8xf32> to vector<8xf32>
    %52 = vector.shape_cast %51 : vector<8xf32> to vector<1x8xf32>
    %53 = arith.addf %50, %52 : vector<1x8xf32>
    %c0_28 = arith.constant 0 : index
    %c0_29 = arith.constant 0 : index
    %54 = vector.load %arg5[%c0_28, %c0_29] : memref<1x8xf32, #tpu.memory_space<vmem>>, vector<1x8xf32>
    tpu.vector_store %arg5[%c0_28, %c0_29], %53 {strides = array<i32>} : memref<1x8xf32, #tpu.memory_space<vmem>>, vector<1x8xf32>,
    %c0_i32_30 = arith.constant 0 : i32
    %55 = arith.cmpi eq, %arg0, %c0_i32_30 : i32
    %56 = arith.extui %55 : i1 to i32
    %c0_i32_31 = arith.constant 0 : i32
    %57 = arith.cmpi ne, %56, %c0_i32_31 : i32
    scf.if %57 {
      %c0_32 = arith.constant 0 : index
      %c0_33 = arith.constant 0 : index
      %58 = vector.load %arg5[%c0_32, %c0_33] : memref<1x8xf32, #tpu.memory_space<vmem>>, vector<1x8xf32>
      %c0_34 = arith.constant 0 : index
      %c0_35 = arith.constant 0 : index
      %59 = vector.load %arg4[%c0_34, %c0_35] : memref<1x8xf32, #tpu.memory_space<vmem>>, vector<1x8xf32>
      %60 = arith.divf %58, %59 : vector<1x8xf32>
      %cst_36 = arith.constant 9.99999974E-6 : f32
      %61 = vector.broadcast %cst_36 : f32 to vector<1x8xf32>
      %62 = arith.addf %60, %61 : vector<1x8xf32>
      %63 = math.log %62 : vector<1x8xf32>
      %cst_37 = arith.constant 0.000000e+00 : f32
      %64 = vector.broadcast %cst_37 : f32 to vector<1x8xf32>
      %65 = arith.subf %64, %63 : vector<1x8xf32>
      %c0_38 = arith.constant 0 : index
      %c0_39 = arith.constant 0 : index
      %66 = vector.load %arg6[%c0_38, %c0_39] : memref<1x1xf32, #tpu.memory_space<vmem>>, vector<1x1xf32>
      %cst_40 = arith.constant dense<0.000000e+00> : vector<1xf32>
      %67 = vector.multi_reduction <add>, %65, %cst_40 [1] : vector<1x8xf32> to vector<1xf32>
      %68 = vector.shape_cast %67 : vector<1xf32> to vector<1x1xf32>
      %69 = arith.addf %66, %68 : vector<1x1xf32>
      %cst_41 = arith.constant 1.250000e-01 : f32
      %70 = vector.broadcast %cst_41 : f32 to vector<1x1xf32>
      %71 = arith.mulf %69, %70 : vector<1x1xf32>
      %c0_42 = arith.constant 0 : index
      %c0_43 = arith.constant 0 : index
      %72 = vector.load %arg3[%c0_42, %c0_43] : memref<1x1xf32, #tpu.memory_space<vmem>>, vector<1x1xf32>
      tpu.vector_store %arg3[%c0_42, %c0_43], %71 {strides = array<i32>} : memref<1x1xf32, #tpu.memory_space<vmem>>, vector<1x1xf32>,
    } else {
    }
    return
  }
  func.func @transform_0(%arg0: i32) -> (i32, i32) {
    %c0_i32 = arith.constant 0 : i32
    %c0_i32_0 = arith.constant 0 : i32
    return %arg0, %c0_i32 : i32, i32
  }
  func.func @transform_1(%arg0: i32) -> (i32, i32) {
    %c0_i32 = arith.constant 0 : i32
    %c0_i32_0 = arith.constant 0 : i32
    %c0_i32_1 = arith.constant 0 : i32
    return %c0_i32, %c0_i32_0 : i32, i32
  }
  func.func @transform_2(%arg0: i32) -> (i32, i32) {
    %c0_i32 = arith.constant 0 : i32
    %c0_i32_0 = arith.constant 0 : i32
    %c0_i32_1 = arith.constant 0 : i32
    return %c0_i32, %c0_i32_0 : i32, i32
  }
}

</mosaic_0001>

<bundles_post_ra>
// kernel: tpu_custom_call.1
= control target key start
LH: loop header
LB: loop body
LE: loop exit
PB: predicated region body
PF: predicated region fallthrough
CT: control target
= control target key end

     0   :  { %vm48_vm0 = vcmask 57344   ;;  %v312_v3 = vmov 0.0|0.0   ;;  %v313_v6 = vmov 0.0   ;;  %s377_s0 = inlined_call_operand.vmem [shape: f32[8,32], index: 0, kind: input, shape index: {}]   ;;  %s378_s1 = inlined_call_operand.vmem [shape: f32[32,8], index: 1, kind: input, shape index: {}]   ;;  %s379_s2 = inlined_call_operand.hbm [shape: f32[1,1], index: 2, kind: output, shape index: {}]  }
   0x1   :  { %v70_v0 = vld [vmem:[%s378_s1] sm:$0xff]  ;;  %v71_v1 = vld [vmem:[%s378_s1 + $0x8] sm:$0xff]  ;;  %v72_v2 = vld [vmem:[%s378_s1 + $0x10] sm:$0xff]  ;;  %260 = vmatprep.subr.bf16.mxu0 %v312_v3  ;;  %50 = vst.msk [vmem:[#allocation2] sm:$0x1] %vm48_vm0, %v313_v6 }
   0x2   :  { %v261_v4 = vpack.c.bf16 %v71_v1, %v70_v0  ;;  %v73_v5 = vld [vmem:[%s378_s1 + $0x18] sm:$0xff]  ;;  %51 = vst.msk [vmem:[#allocation3] sm:$0x1] %vm48_vm0, %v313_v6  ;;  %v54_v7 = vld [vmem:[%s377_s0] sm:$0xff] }
   0x3   :  { %7 = vsyncpa [#allocation7], 0  ;;  %vm314_vm1 = vmmov 0   ;;  %v55_v8 = vmul.f32 %v54_v7, %v54_v7  ;;  %v264_v9 = vpack.c.bf16 %v73_v5, %v72_v2  ;;  %vm56_vm2 = vcmask 261120   ;;  %s315_s0 = smov [#allocation6]  }
   0x4   :  { %257 = vmatprep.mubr.msk.f32.mxu0 %vm314_vm1, %v313_v6  ;;  %262 = vmatpush3.bf16.msra.mxu0 %v261_v4  ;;  %v20_v11 = vmul.f32 %v70_v0, %v70_v0  ;;  %v21_v12 = vmul.f32 %v71_v1, %v71_v1  ;;  %vm24_vm3 = vcmask 64512   ;;  %v22_v13 = vmul.f32 %v72_v2, %v72_v2  ;;  %s234_s1 = sshll.u32 %s315_s0, 4  ;;  %s235_s1 = int_to_ptr.vmem [resolvable:$true] %s234_s1 }
   0x5   :  { %263 = vmatprep.subr.bf16.mxu0 %v312_v3  ;;  %v57_v10 = vsel %vm56_vm2, %v55_v8, 0.0  ;;  %v23_v17 = vmul.f32 %v73_v5, %v73_v5  ;;  %v159_v50 = vlaneseq  ;;  %vm52_vm9 = vcmask 0   ;;  %s288_s19 = scalar_lea.vmem %s235_s1, 16  ;;  %s292_s20 = scalar_lea.vmem %s235_s1, 32 }
   0x6   :  { %58 = vadd.xlane.f32.xlu0 %v57_v10  ;;  %v25_v14 = vsel %vm24_vm3, %v20_v11, 0.0  ;;  %v26_v15 = vsel %vm24_vm3, %v21_v12, 0.0  ;;  %v28_v18 = vsel %vm24_vm3, %v22_v13, 0.0  ;;  %53 = vst.msk [vmem:[#allocation4] sm:$0x1] %vm52_vm9, %v313_v6  ;;  %p289_p0 = scmp.ne.s32.totalorder %s235_s1, %s288_s19  ;;  %p293_p1 = scmp.lt.s32.totalorder %s235_s1, %s235_s1 }
   0x7   :  { %v27_v16 = vadd.f32 %v26_v15, %v25_v14  ;;  %v30_v20 = vsel %vm24_vm3, %v23_v17, 0.0  ;;  %v160_v51 = vshrl.u32 %v159_v50, 7  ;;  %v162_v52 = vand.u32 127, %v159_v50  ;;  %p294_p2 = scmp.lt.s32.totalorder %s292_s20, %s288_s19 }
   0x8   :  { %265 = vmatpush3.bf16.msra.mxu0 %v264_v9  ;;  %v191_v2 = vld [vmem:[#allocation2] sm:$0x1] }
   0x9   :  { %v29_v19 = vadd.f32 %v28_v18, %v27_v16  ;;  %vm166_vm8 = vcmp.eq.s32.totalorder %v162_v52, %v160_v51  ;;  %v201_v5 = vld [vmem:[#allocation3] sm:$0x1]  ;;  %p295_p3 = por %p294_p2, %p293_p1 }
   0xb   :  { %258 = vmatmul.mubr.msk.f32.vlgmr.msra.gmra.mrb[0].mxu0 %vm56_vm2, %v54_v7  ;;  %v31_v21 = vadd.f32 %v30_v20, %v29_v19  ;;  %p296_p4 = pnand %p295_p3, %p289_p0 }
   0xd   :  { %v32_v22 = vrot.slane %v31_v21, 4  ;;  %v181_v6 = vld [vmem:[#allocation4] sm:$0x1] }
   0xf   :  { %v33_v23 = vadd.f32 %v32_v22, %v31_v21 }
  0x11   :  { %v34_v24 = vrot.slane %v33_v23, 2 }
  0x13   :  { %v35_v25 = vadd.f32 %v34_v24, %v33_v23 }
  0x15   :  { %v36_v26 = vrot.slane %v35_v25, 1 }
  0x17   :  { %v37_v27 = vadd.f32 %v36_v26, %v35_v25 }
  0x19   :  { %270 = vrsqrt.f32 %v37_v27  ;;  %vm40_vm4 = vcmp.eq.f32.partialorder %v37_v27, inf  ;;  %v43_v29 = vand.u32 2147483648, %v37_v27  ;;  %vm42_vm5 = vcmp.eq.f32.partialorder %v37_v27, 0.0 }
  0x23   :  { %v271_v28 = vpop.eup %270 }
  0x24   :  { %v39_v30 = vmul.f32 %v271_v28, %v37_v27 }
  0x26   :  { %v41_v31 = vsel %vm40_vm4, %v37_v27, %v39_v30 }
  0x27   :  { %v44_v32 = vsel %vm42_vm5, %v43_v29, %v41_v31 }
  0x28   :  { %v45_v33 = vmax.f32 %v44_v32, 1e-12 }
  0x2a   :  { %272 = vrcp.f32 %v45_v33 }
  0x34   :  { %v273_v34 = vpop.eup %272 }
  0x35   :  { %49 = vst.msk [vmem:[#allocation5] sm:$0x1] %vm48_vm0, %v273_v34 }
  0x3c   :  { %v243_v44 = vld [vmem:[#allocation5] ss:$0 sm:$0xff] }
  0x93   :  { %v59_v35 = vpop.xlane.xlu0 %58 }
  0x94   :  { %274 = vrsqrt.f32 %v59_v35  ;;  %vm62_vm6 = vcmp.eq.f32.partialorder %v59_v35, inf  ;;  %v65_v38 = vand.u32 2147483648, %v59_v35  ;;  %vm64_vm7 = vcmp.eq.f32.partialorder %v59_v35, 0.0 }
  0x9e   :  { %v275_v36 = vpop.eup %274 }
  0x9f   :  { %v61_v37 = vmul.f32 %v275_v36, %v59_v35 }
  0xa1   :  { %v63_v39 = vsel %vm62_vm6, %v59_v35, %v61_v37 }
  0xa2   :  { %v66_v40 = vsel %vm64_vm7, %v65_v38, %v63_v39 }
  0xa3   :  { %v67_v41 = vmax.f32 %v66_v40, 1e-12 }
  0xa5   :  { %276 = vrcp.f32 %v67_v41 }
  0xaf   :  { %v277_v42 = vpop.eup %276 }
  0xb0   :  { %v147_v43 = vmul.f32 20.0, %v277_v42 }
  0xb2   :  { %v155_v45 = vmul.f32 %v243_v44, %v147_v43 }
  0xde   :  { %v143_v46 = vpop.f32.mrb[0].mxu0 }
  0xdf   :  { %v156_v47 = vmul.f32 %v155_v45, %v143_v46  ;;  %v259_v48 = vpop.f32.mrb[1].mxu0 }
  0xe1   :  { %v157_v49 = vmul.f32 1.442695, %v156_v47 }
  0xe3   :  { %278 = vpow2.f32 %v157_v49 }
  0xed   :  { %v279_v53 = vpop.eup %278 }
  0xee   :  { %v172_v54 = vsel %vm24_vm3, %v279_v53, 0.0  ;;  %v167_v55 = vsel %vm166_vm8, %v279_v53, 0.0 }
  0xef   :  { %173 = vadd.xlane.f32.xlu0 %v172_v54  ;;  %v192_v56 = vrot.slane %v172_v54, 4  ;;  %v169_v57 = vsel %vm24_vm3, %v167_v55, 0.0 }
  0xf0   :  { %170 = vadd.xlane.f32.xlu1 %v169_v57  ;;  %v202_v58 = vrot.slane %v169_v57, 4 }
  0xf1   :  { %v193_v59 = vadd.f32 %v192_v56, %v172_v54 }
  0xf2   :  { %v203_v60 = vadd.f32 %v202_v58, %v169_v57 }
  0xf3   :  { %v194_v61 = vrot.slane %v193_v59, 2 }
  0xf4   :  { %v204_v62 = vrot.slane %v203_v60, 2 }
  0xf5   :  { %v195_v63 = vadd.f32 %v194_v61, %v193_v59 }
  0xf6   :  { %v205_v0 = vadd.f32 %v204_v62, %v203_v60 }
  0xf7   :  { %v196_v1 = vrot.slane %v195_v63, 1 }
  0xf8   :  { %v206_v3 = vrot.slane %v205_v0, 1 }
  0xf9   :  { %v197_v4 = vadd.f32 %v196_v1, %v195_v63 }
  0xfa   :  { %v207_v7 = vadd.f32 %v206_v3, %v205_v0 }
  0xfb   :  { %v198_v8 = vadd.f32 %v197_v4, %v191_v2 }
  0xfc   :  { %v208_v9 = vadd.f32 %v207_v7, %v201_v5 }
  0xfd   :  { %200 = vst.msk [vmem:[#allocation2] sm:$0x1] %vm48_vm0, %v198_v8 }
  0xfe   :  { %209 = vst.msk [vmem:[#allocation3] sm:$0x1] %vm48_vm0, %v208_v9 }
 0x104   :  { %v214_v10 = vld [vmem:[#allocation2] sm:$0x1] }
 0x105   :  { %280 = vrcp.f32 %v214_v10  ;;  %v213_v12 = vld [vmem:[#allocation3] sm:$0x1] }
 0x10f   :  { %v281_v11 = vpop.eup %280 }
 0x110   :  { %v216_v13 = vmul.f32 %v281_v11, %v213_v12 }
 0x112   :  { %v217_v14 = vadd.f32 1e-05, %v216_v13 }
 0x114   :  { %282 = vlog2.f32 %v217_v14 }
 0x11e   :  { %v283_v15 = vpop.eup %282 }
 0x11f   :  { %v219_v16 = vmul.f32 0.6931472, %v283_v15 }
 0x121   :  { %v220_v17 = vsub.f32 0.0, %v219_v16 }
 0x123   :  { %v222_v18 = vsel %vm48_vm0, %v220_v17, 0.0 }
 0x124   :  { %223 = vadd.xlane.f32.xlu1 %v222_v18 }
 0x17c   :  { %v174_v19 = vpop.xlane.xlu0 %173 }
 0x17d   :  { %284 = vrcp.f32 %v174_v19  ;;  %v171_v21 = vpop.xlane.xlu1 %170 }
 0x187   :  { %v285_v20 = vpop.eup %284 }
 0x188   :  { %v176_v22 = vmul.f32 %v285_v20, %v171_v21 }
 0x18a   :  { %v177_v23 = vadd.f32 1e-05, %v176_v22 }
 0x18c   :  { %286 = vlog2.f32 %v177_v23 }
 0x196   :  { %v287_v24 = vpop.eup %286 }
 0x197   :  { %v179_v25 = vmul.f32 0.6931472, %v287_v24 }
 0x199   :  { %v180_v26 = vsub.f32 0.0, %v179_v25 }
 0x19b   :  { %v182_v27 = vrot.slane %v180_v26, 4 }
 0x19d   :  { %v183_v28 = vadd.f32 %v182_v27, %v180_v26 }
 0x19f   :  { %v184_v29 = vrot.slane %v183_v28, 2 }
 0x1a1   :  { %v185_v30 = vadd.f32 %v184_v29, %v183_v28 }
 0x1a3   :  { %v186_v31 = vrot.slane %v185_v30, 1 }
 0x1a5   :  { %v187_v32 = vadd.f32 %v186_v31, %v185_v30 }
 0x1a7   :  { %v188_v33 = vadd.f32 %v187_v32, %v181_v6 }
 0x1a9   :  { %190 = vst.msk [vmem:[#allocation4] sm:$0x1] %vm52_vm9, %v188_v33 }
 0x1b0   :  { %v221_v34 = vld [vmem:[#allocation4] sm:$0x1] }
 0x1b1   :  { %v224_v35 = vpop.xlane.xlu1 %223 }
 0x1b2   :  { %v225_v36 = vadd.f32 %v224_v35, %v221_v34 }
 0x1b4   :  { %v226_v37 = vmul.f32 0.125, %v225_v36 }
 0x1b6   :  { %227 = vst.msk [vmem:[#allocation6] sm:$0x1] %vm52_vm9, %v226_v37 }
 0x1b7   :  { %299 = shalt.err (!%p296_p4)
}
 0x1b8   :  { %s300_s23 = scalar_lea.hbm %s379_s2, 16 }
 0x1b9   :  { %p301_p5 = scmp.ne.s32.totalorder %s379_s2, %s300_s23  ;;  %p304_p6 = scmp.lt.u32.totalorder %s300_s23, %s379_s2 }
 0x1bb   :  { %p306_p7 = pnand %p304_p6, %p301_p5 }
 0x1bd   :  { %309 = shalt.err (!%p306_p7)
}
 0x1be   :  { %237 = dma.vmem_to_hbm [thread:$0]  %s235_s1, 16, %s379_s2, [#allocation7]  }
 0x1bf   :  { %310 = dma.done.wait [#allocation7], 16  }
 0x1c0   :  { %311 = vsyncadd [#allocation7], 4294967280 }
 0x1c1   :  { %241 = vsyncpa [#allocation7], 1 }

</bundles_post_ra>
